<compile_context>
chip_gen: v5e
topology: v5e:2x2
jax: 0.10.0
libtpu: 0.0.40
codegen_flags: <defaults>
</compile_context>

<pallas_src>
import functools
import math
import numpy as np
import jax
import jax.numpy as jnp
from jax.experimental import pallas as pl
from jax.experimental.pallas import tpu as pltpu


# ----------------------------- kernel ---------------------------------------


def _erf(z):
    # Numerical-Recipes erfc approximation (|err| < 1.3e-7) using only
    # exp / abs / where, which all lower cleanly in Mosaic.  Matches PyTorch's
    # default exact (erf-based) GELU to f32 precision.
    a = jnp.abs(z)
    t = 1.0 / (1.0 + 0.5 * a)
    poly = -1.26551223 + t * (1.00002368 + t * (0.37409196 + t * (0.09678418 +
           t * (-0.18628806 + t * (0.27886807 + t * (-1.13520398 + t * (1.48851587 +
           t * (-0.82215223 + t * 0.17087277))))))))
    tau = t * jnp.exp(-a * a + poly)
    return jnp.where(z >= 0.0, 1.0 - tau, tau - 1.0)


def dffm_kernel(x_ref, w1_ref, b1_ref, w2_ref, b2_ref, awc_ref, ah_ref, o_ref,
                *, nb, H):
    # x_ref block: (nb*H, W*Cin_pad) bf16; conv weights bf16; upsample f32.
    x = x_ref[...]

    # Conv2d(in, out, 1) with BN1 pre-folded (block-diagonal kron(I_W, w1f)).
    # bf16 operands, f32 MXU accumulation.
    y = jnp.dot(x, w1_ref[...], preferred_element_type=jnp.float32) + b1_ref[...]

    # GELU (exact, erf-based), f32 on the VPU/EUP.
    y = 0.5 * y * (1.0 + _erf(y * 0.7071067811865476))

    # Conv2d(out, out, 1) with BN2 post-folded.
    y = jnp.dot(y.astype(jnp.bfloat16), w2_ref[...],
                preferred_element_type=jnp.float32) + b2_ref[...]    # (nb*H, W*Cout)

    # Upsample(scale_factor=2, bilinear, align_corners=True) — separable.
    # Columns FIRST (fewer total MACs than rows-first), kept in f32 so the
    # align_corners coefficients are exact:
    #   t = y @ kron(A_w, I_C)^T                 (nb*H, 2W*Cout)
    t = jnp.dot(y, awc_ref[...], preferred_element_type=jnp.float32)

    # Rows per batch with the small (2H, H) matrix — static-slice loop over the
    # nb batches fused in this block (no dense kron(I_nb, A_h) waste).
    ah = ah_ref[...]
    rows = []
    for b in range(nb):
        rows.append(jnp.dot(ah, t[b * H:(b + 1) * H, :],
                            preferred_element_type=jnp.float32))
    o_ref[...] = jnp.concatenate(rows, axis=0).astype(o_ref.dtype)   # one lane-dense store


# ----------------------------- glue / wrapper --------------------------------


def _bilinear_matrix(in_size, scale=2):
    """Row-interpolation matrix for 2x bilinear upsample, align_corners=True."""
    out_size = in_size * scale
    A = np.zeros((out_size, in_size), dtype=np.float32)
    if in_size == 1:
        A[:, 0] = 1.0
        return A
    for i in range(out_size):
        src = i * (in_size - 1) / (out_size - 1)
        i0 = min(int(math.floor(src)), in_size - 1)
        i1 = min(i0 + 1, in_size - 1)
        f = src - i0
        A[i, i0] += 1.0 - f
        A[i, i1] += f
    return A


def _pad_channels_to_lane(c, w, lane=128):
    """Smallest c' >= c such that w*c' is a multiple of `lane`."""
    step = lane // math.gcd(w, lane)
    return ((c + step - 1) // step) * step


def make_dffm_params(key, in_channels, out_channels):
    """Deterministic synthetic parameters (shapes implied by the nn.Module)."""
    ks = jax.random.split(key, 10)
    eps = 1e-5
    p = {}
    # BatchNorm2d(in_channels)
    p["bn1_gamma"] = jax.random.uniform(ks[0], (in_channels,), jnp.float32, 0.5, 1.5)
    p["bn1_beta"] = 0.1 * jax.random.normal(ks[1], (in_channels,), jnp.float32)
    p["bn1_mean"] = 0.1 * jax.random.normal(ks[2], (in_channels,), jnp.float32)
    p["bn1_var"] = jax.random.uniform(ks[3], (in_channels,), jnp.float32, 0.5, 1.5)
    # Conv2d(in, out, 1)
    p["w1"] = jax.random.normal(ks[4], (in_channels, out_channels), jnp.float32) / math.sqrt(in_channels)
    p["b1"] = 0.1 * jax.random.normal(ks[5], (out_channels,), jnp.float32)
    # Conv2d(out, out, 1)
    p["w2"] = jax.random.normal(ks[6], (out_channels, out_channels), jnp.float32) / math.sqrt(out_channels)
    p["b2"] = 0.1 * jax.random.normal(ks[7], (out_channels,), jnp.float32)
    # BatchNorm2d(out_channels)
    p["bn2_gamma"] = jax.random.uniform(ks[8], (out_channels,), jnp.float32, 0.5, 1.5)
    p["bn2_beta"] = 0.1 * jax.random.normal(ks[9], (out_channels,), jnp.float32)
    p["bn2_mean"] = jnp.zeros((out_channels,), jnp.float32)
    p["bn2_var"] = jnp.ones((out_channels,), jnp.float32)
    p["eps"] = eps
    return p


def dffm_forward(x_nchw, params, batch_blocks=None):
    """x_nchw: (N, Cin, H, W) float32 -> (N, Cout, 2H, 2W) float32."""
    N, Cin, H, W = x_nchw.shape
    Cout = params["w1"].shape[1]
    eps = params["eps"]

    # Grid blocking: keep everything in ONE block unless each of two blocks
    # would still carry >= 256 slab rows (fills the v6e/v7x MXU and makes the
    # 2-wide "parallel" grid worth megacore sharding on v7x).
    if batch_blocks is None:
        batch_blocks = 2 if (N % 2 == 0 and (N // 2) * H >= 256) else 1
    assert N % batch_blocks == 0, "N must be divisible by batch_blocks"
    nb = N // batch_blocks

    # Pad Cin so the input lane width W*Cin_pad is a multiple of 128
    # (unmasked full-width loads, fuller MXU contraction; zeros are inert —
    # the corresponding w1 rows are zero).
    Cinp = _pad_channels_to_lane(Cin, W)

    # ---- msf (dmsaf) treated as identity (definition not provided) ----
    x_msf = x_nchw

    # NCHW -> (N, H, W, Cin) -> zero-pad channels -> fused slab (N*H, W*Cin_pad),
    # cast to bf16 so the kernel input HBM stream is halved and goes straight
    # into the first matmul.
    xt = jnp.transpose(x_msf, (0, 2, 3, 1)).astype(jnp.float32)
    if Cinp != Cin:
        xt = jnp.pad(xt, ((0, 0), (0, 0), (0, 0), (0, Cinp - Cin)))
    x = xt.reshape(N * H, W * Cinp).astype(jnp.bfloat16)

    # ---- fold eval-mode BN1 / BN2 into the conv weights & biases (exact) ----
    #   BN1 then conv1:  x@ (diag(s1) W1) + (t1 @ W1 + b1)
    #   conv2 then BN2:  h@ (W2 diag(s2)) + (b2*s2 + t2)
    w1 = np.asarray(params["w1"], np.float32); b1 = np.asarray(params["b1"], np.float32)
    w2 = np.asarray(params["w2"], np.float32); b2 = np.asarray(params["b2"], np.float32)
    s1 = np.asarray(params["bn1_gamma"]) / np.sqrt(np.asarray(params["bn1_var"]) + eps)
    t1 = np.asarray(params["bn1_beta"]) - np.asarray(params["bn1_mean"]) * s1
    s2 = np.asarray(params["bn2_gamma"]) / np.sqrt(np.asarray(params["bn2_var"]) + eps)
    t2 = np.asarray(params["bn2_beta"]) - np.asarray(params["bn2_mean"]) * s2
    w1f = s1[:, None] * w1                      # (Cin, Cout)
    b1f = t1 @ w1 + b1                          # (Cout,)
    w2f = w2 * s2[None, :]                      # (Cout, Cout)
    b2f = b2 * s2 + t2                          # (Cout,)

    # Zero rows for padded input channels, then block-diagonal kron weights
    # (bf16: MXU-native, half the HBM->VMEM bytes).
    w1p = np.zeros((Cinp, Cout), dtype=np.float32)
    w1p[:Cin, :] = w1f
    w1_big = jnp.asarray(np.kron(np.eye(W, dtype=np.float32), w1p), jnp.bfloat16)   # (W*Cinp, W*Cout)
    w2_big = jnp.asarray(np.kron(np.eye(W, dtype=np.float32), w2f), jnp.bfloat16)   # (W*Cout, W*Cout)
    b1_t = jnp.asarray(np.tile(b1f, W).reshape(1, W * Cout), jnp.float32)
    b2_t = jnp.asarray(np.tile(b2f, W).reshape(1, W * Cout), jnp.float32)

    # Bilinear 2x upsample (align_corners=True), separable; kept f32 for parity.
    aw = _bilinear_matrix(W)                                                          # (2W, W)
    awc_t = jnp.asarray(np.kron(aw, np.eye(Cout, dtype=np.float32)).T, jnp.float32)   # (W*Cout, 2W*Cout)
    ah = jnp.asarray(_bilinear_matrix(H), jnp.float32)                                # (2H, H), applied per batch

    HB = nb * H
    WC_in, WC_out, WC2 = W * Cinp, W * Cout, 2 * W * Cout

    # NOTE: with grid=(1,) for the toy shape, extra pipeline buffers are moot;
    # when batch_blocks > 1 at scale, mark the constant-index operands
    # (weights / biases / upsample matrices) with pipeline_mode=pl.Buffered(1)
    # to drop their second VMEM buffer, and budget VMEM explicitly for v7x
    # (64 MiB) via pltpu.CompilerParams(vmem_limit_bytes=...).
    kernel = functools.partial(dffm_kernel, nb=nb, H=H)
    out = pl.pallas_call(
        kernel,
        out_shape=jax.ShapeDtypeStruct((N * 2 * H, WC2), jnp.float32),
        grid_spec=pltpu.PrefetchScalarGridSpec(
            num_scalar_prefetch=0,
            grid=(batch_blocks,),
            in_specs=[
                pl.BlockSpec((HB, WC_in), lambda i: (i, 0)),       # x slab (bf16)
                pl.BlockSpec((WC_in, WC_out), lambda i: (0, 0)),   # BN1-folded conv1 weight (bf16)
                pl.BlockSpec((1, WC_out), lambda i: (0, 0)),       # conv1 bias (f32)
                pl.BlockSpec((WC_out, WC_out), lambda i: (0, 0)),  # BN2-folded conv2 weight (bf16)
                pl.BlockSpec((1, WC_out), lambda i: (0, 0)),       # conv2 bias (f32)
                pl.BlockSpec((WC_out, WC2), lambda i: (0, 0)),     # kron(A_w, I_C)^T (f32)
                pl.BlockSpec((2 * H, H), lambda i: (0, 0)),        # A_h (f32), applied per batch
            ],
            out_specs=pl.BlockSpec((2 * HB, WC2), lambda i: (i, 0)),
        ),
        compiler_params=pltpu.CompilerParams(dimension_semantics=("parallel",)),
    )(x, w1_big, b1_t, w2_big, b2_t, awc_t, ah)

    # (N*2H, 2W*Cout) -> NCHW (N, Cout, 2H, 2W)
    out = out.reshape(N, 2 * H, 2 * W, Cout).transpose(0, 3, 1, 2)
    return out


# ----------------------------- pure-JAX reference ----------------------------


def dffm_reference(x, p):
    """f32 NCHW reference of the same forward (eval-mode BN, exact GELU)."""
    eps = p["eps"]
    s1 = p["bn1_gamma"] / jnp.sqrt(p["bn1_var"] + eps)
    t1 = p["bn1_beta"] - p["bn1_mean"] * s1
    s2 = p["bn2_gamma"] / jnp.sqrt(p["bn2_var"] + eps)
    t2 = p["bn2_beta"] - p["bn2_mean"] * s2
    y = x * s1[None, :, None, None] + t1[None, :, None, None]
    y = jnp.einsum("nchw,cd->ndhw", y, p["w1"]) + p["b1"][None, :, None, None]
    y = jax.nn.gelu(y, approximate=False)
    y = jnp.einsum("nchw,cd->ndhw", y, p["w2"]) + p["b2"][None, :, None, None]
    y = y * s2[None, :, None, None] + t2[None, :, None, None]
    ah = jnp.asarray(_bilinear_matrix(y.shape[2]))
    aw = jnp.asarray(_bilinear_matrix(y.shape[3]))
    y = jnp.einsum("ih,nchw->nciw", ah, y)
    y = jnp.einsum("jw,nciw->ncij", aw, y)
    return y


# ----------------------------- main ------------------------------------------

if __name__ == "__main__":
    N, Cin, Cout, H, W = 2, 4, 8, 16, 16   # DFFM(in_channels=4, out_channels=8, sample=True, up=True)

    key = jax.random.PRNGKey(0)
    k_x, k_p = jax.random.split(key)
    x = jax.random.normal(k_x, (N, Cin, H, W), jnp.float32)   # PyTorch NCHW input

    params = make_dffm_params(k_p, Cin, Cout)

    y = dffm_forward(x, params)
    y = jax.block_until_ready(y)

    assert y.shape == (N, Cout, 2 * H, 2 * W), y.shape
    assert bool(jnp.all(jnp.isfinite(y)))

    # Loose sanity check vs the f32 reference (kernel uses bf16 conv weights /
    # activations, so bit-parity is not expected; layout bugs would be O(1)).
    ref = dffm_reference(x, params)
    max_err = float(jnp.max(jnp.abs(y - ref)))
    assert max_err < 0.25, f"max abs error vs reference too large: {max_err}"

    print("KERNEL_OK")
</pallas_src>

<mosaic_0001>
module attributes {stable_mosaic.version = 11 : i64} {
  func.func @dffm_kernel(%arg0: i32, %arg1: memref<32x128xbf16, #tpu.memory_space<vmem>>, %arg2: memref<128x128xbf16, #tpu.memory_space<vmem>>, %arg3: memref<1x128xf32, #tpu.memory_space<vmem>>, %arg4: memref<128x128xbf16, #tpu.memory_space<vmem>>, %arg5: memref<1x128xf32, #tpu.memory_space<vmem>>, %arg6: memref<128x256xf32, #tpu.memory_space<vmem>>, %arg7: memref<32x16xf32, #tpu.memory_space<vmem>>, %arg8: memref<64x256xf32, #tpu.memory_space<vmem>>) attributes {dimension_semantics = [#tpu.dimension_semantics<parallel>], iteration_bounds = array<i64: 1>, scalar_prefetch = 0 : i64, scratch_operands = 0 : i64, tpu.core_type = #tpu.core_type<tc>, window_params = [{transform_indices = @transform_0, window_bounds = array<i64: 32, 128>}, {pipeline_mode = #tpu.pipeline_mode<synchronous>, transform_indices = @transform_1, window_bounds = array<i64: 128, 128>}, {pipeline_mode = #tpu.pipeline_mode<synchronous>, transform_indices = @transform_2, window_bounds = array<i64: 1, 128>}, {pipeline_mode = #tpu.pipeline_mode<synchronous>, transform_indices = @transform_3, window_bounds = array<i64: 128, 128>}, {pipeline_mode = #tpu.pipeline_mode<synchronous>, transform_indices = @transform_4, window_bounds = array<i64: 1, 128>}, {pipeline_mode = #tpu.pipeline_mode<synchronous>, transform_indices = @transform_5, window_bounds = array<i64: 128, 256>}, {pipeline_mode = #tpu.pipeline_mode<synchronous>, transform_indices = @transform_6, window_bounds = array<i64: 32, 16>}, {transform_indices = @transform_7, window_bounds = array<i64: 64, 256>}]} {
    %c0 = arith.constant 0 : index
    %c0_0 = arith.constant 0 : index
    %0 = vector.load %arg1[%c0, %c0_0] : memref<32x128xbf16, #tpu.memory_space<vmem>>, vector<32x128xbf16>
    %c0_1 = arith.constant 0 : index
    %c0_2 = arith.constant 0 : index
    %1 = vector.load %arg2[%c0_1, %c0_2] : memref<128x128xbf16, #tpu.memory_space<vmem>>, vector<128x128xbf16>
    %cst = arith.constant dense<0.000000e+00> : vector<32x128xf32>
    %2 = tpu.matmul %0, %1, %cst {dimension_numbers = #tpu.dot_dimension_numbers<[1], [0], [0], [1], [0, 0, 1, 1], [], []>} : vector<32x128xbf16>, vector<128x128xbf16>, vector<32x128xf32> -> vector<32x128xf32>
    %c0_3 = arith.constant 0 : index
    %c0_4 = arith.constant 0 : index
    %3 = vector.load %arg3[%c0_3, %c0_4] : memref<1x128xf32, #tpu.memory_space<vmem>>, vector<1x128xf32>
    %4 = vector.broadcast %3 : vector<1x128xf32> to vector<32x128xf32>
    %5 = arith.addf %2, %4 : vector<32x128xf32>
    %cst_5 = arith.constant 5.000000e-01 : f32
    %6 = vector.broadcast %cst_5 : f32 to vector<32x128xf32>
    %7 = arith.mulf %6, %5 : vector<32x128xf32>
    %cst_6 = arith.constant 0.707106769 : f32
    %8 = vector.broadcast %cst_6 : f32 to vector<32x128xf32>
    %9 = arith.mulf %5, %8 : vector<32x128xf32>
    %10 = math.absf %9 : vector<32x128xf32>
    %cst_7 = arith.constant 5.000000e-01 : f32
    %11 = vector.broadcast %cst_7 : f32 to vector<32x128xf32>
    %12 = arith.mulf %11, %10 : vector<32x128xf32>
    %cst_8 = arith.constant 1.000000e+00 : f32
    %13 = vector.broadcast %cst_8 : f32 to vector<32x128xf32>
    %14 = arith.addf %13, %12 : vector<32x128xf32>
    %cst_9 = arith.constant 1.000000e+00 : f32
    %15 = vector.broadcast %cst_9 : f32 to vector<32x128xf32>
    %16 = arith.divf %15, %14 : vector<32x128xf32>
    %cst_10 = arith.constant 0.170872763 : f32
    %17 = vector.broadcast %cst_10 : f32 to vector<32x128xf32>
    %18 = arith.mulf %16, %17 : vector<32x128xf32>
    %cst_11 = arith.constant -0.822152256 : f32
    %19 = vector.broadcast %cst_11 : f32 to vector<32x128xf32>
    %20 = arith.addf %19, %18 : vector<32x128xf32>
    %21 = arith.mulf %16, %20 : vector<32x128xf32>
    %cst_12 = arith.constant 1.48851585 : f32
    %22 = vector.broadcast %cst_12 : f32 to vector<32x128xf32>
    %23 = arith.addf %22, %21 : vector<32x128xf32>
    %24 = arith.mulf %16, %23 : vector<32x128xf32>
    %cst_13 = arith.constant -1.13520396 : f32
    %25 = vector.broadcast %cst_13 : f32 to vector<32x128xf32>
    %26 = arith.addf %25, %24 : vector<32x128xf32>
    %27 = arith.mulf %16, %26 : vector<32x128xf32>
    %cst_14 = arith.constant 0.278868079 : f32
    %28 = vector.broadcast %cst_14 : f32 to vector<32x128xf32>
    %29 = arith.addf %28, %27 : vector<32x128xf32>
    %30 = arith.mulf %16, %29 : vector<32x128xf32>
    %cst_15 = arith.constant -0.186288059 : f32
    %31 = vector.broadcast %cst_15 : f32 to vector<32x128xf32>
    %32 = arith.addf %31, %30 : vector<32x128xf32>
    %33 = arith.mulf %16, %32 : vector<32x128xf32>
    %cst_16 = arith.constant 0.0967841818 : f32
    %34 = vector.broadcast %cst_16 : f32 to vector<32x128xf32>
    %35 = arith.addf %34, %33 : vector<32x128xf32>
    %36 = arith.mulf %16, %35 : vector<32x128xf32>
    %cst_17 = arith.constant 0.374091953 : f32
    %37 = vector.broadcast %cst_17 : f32 to vector<32x128xf32>
    %38 = arith.addf %37, %36 : vector<32x128xf32>
    %39 = arith.mulf %16, %38 : vector<32x128xf32>
    %cst_18 = arith.constant 1.00002372 : f32
    %40 = vector.broadcast %cst_18 : f32 to vector<32x128xf32>
    %41 = arith.addf %40, %39 : vector<32x128xf32>
    %42 = arith.mulf %16, %41 : vector<32x128xf32>
    %cst_19 = arith.constant -1.26551223 : f32
    %43 = vector.broadcast %cst_19 : f32 to vector<32x128xf32>
    %44 = arith.addf %43, %42 : vector<32x128xf32>
    %cst_20 = arith.constant 0.000000e+00 : f32
    %45 = vector.broadcast %cst_20 : f32 to vector<32x128xf32>
    %46 = arith.subf %45, %10 : vector<32x128xf32>
    %47 = arith.mulf %46, %10 : vector<32x128xf32>
    %48 = arith.addf %47, %44 : vector<32x128xf32>
    %49 = math.exp %48 : vector<32x128xf32>
    %50 = arith.mulf %16, %49 : vector<32x128xf32>
    %cst_21 = arith.constant 0.000000e+00 : f32
    %51 = vector.broadcast %cst_21 : f32 to vector<32x128xf32>
    %52 = arith.cmpf oge, %9, %51 : vector<32x128xf32>
    %cst_22 = arith.constant 1.000000e+00 : f32
    %53 = vector.broadcast %cst_22 : f32 to vector<32x128xf32>
    %54 = arith.subf %53, %50 : vector<32x128xf32>
    %cst_23 = arith.constant 1.000000e+00 : f32
    %55 = vector.broadcast %cst_23 : f32 to vector<32x128xf32>
    %56 = arith.subf %50, %55 : vector<32x128xf32>
    %57 = arith.select %52, %54, %56 : vector<32x128xi1>, vector<32x128xf32>
    %cst_24 = arith.constant 1.000000e+00 : f32
    %58 = vector.broadcast %cst_24 : f32 to vector<32x128xf32>
    %59 = arith.addf %58, %57 : vector<32x128xf32>
    %60 = arith.mulf %7, %59 : vector<32x128xf32>
    %61 = arith.truncf %60 : vector<32x128xf32> to vector<32x128xbf16>
    %c0_25 = arith.constant 0 : index
    %c0_26 = arith.constant 0 : index
    %62 = vector.load %arg4[%c0_25, %c0_26] : memref<128x128xbf16, #tpu.memory_space<vmem>>, vector<128x128xbf16>
    %cst_27 = arith.constant dense<0.000000e+00> : vector<32x128xf32>
    %63 = tpu.matmul %61, %62, %cst_27 {dimension_numbers = #tpu.dot_dimension_numbers<[1], [0], [0], [1], [0, 0, 1, 1], [], []>} : vector<32x128xbf16>, vector<128x128xbf16>, vector<32x128xf32> -> vector<32x128xf32>
    %c0_28 = arith.constant 0 : index
    %c0_29 = arith.constant 0 : index
    %64 = vector.load %arg5[%c0_28, %c0_29] : memref<1x128xf32, #tpu.memory_space<vmem>>, vector<1x128xf32>
    %65 = vector.broadcast %64 : vector<1x128xf32> to vector<32x128xf32>
    %66 = arith.addf %63, %65 : vector<32x128xf32>
    %c0_30 = arith.constant 0 : index
    %c0_31 = arith.constant 0 : index
    %67 = vector.load %arg6[%c0_30, %c0_31] : memref<128x256xf32, #tpu.memory_space<vmem>>, vector<128x256xf32>
    %cst_32 = arith.constant dense<0.000000e+00> : vector<32x256xf32>
    %68 = tpu.matmul %66, %67, %cst_32 {dimension_numbers = #tpu.dot_dimension_numbers<[1], [0], [0], [1], [0, 0, 1, 1], [], []>} : vector<32x128xf32>, vector<128x256xf32>, vector<32x256xf32> -> vector<32x256xf32>
    %c0_33 = arith.constant 0 : index
    %c0_34 = arith.constant 0 : index
    %69 = vector.load %arg7[%c0_33, %c0_34] : memref<32x16xf32, #tpu.memory_space<vmem>>, vector<32x16xf32>
    %70 = vector.extract_strided_slice %68 {offsets = [0, 0], sizes = [16, 256], strides = [1, 1]} : vector<32x256xf32> to vector<16x256xf32>
    %cst_35 = arith.constant dense<0.000000e+00> : vector<32x256xf32>
    %71 = tpu.matmul %69, %70, %cst_35 {dimension_numbers = #tpu.dot_dimension_numbers<[1], [0], [0], [1], [0, 0, 1, 1], [], []>} : vector<32x16xf32>, vector<16x256xf32>, vector<32x256xf32> -> vector<32x256xf32>
    %72 = vector.extract_strided_slice %68 {offsets = [16, 0], sizes = [16, 256], strides = [1, 1]} : vector<32x256xf32> to vector<16x256xf32>
    %cst_36 = arith.constant dense<0.000000e+00> : vector<32x256xf32>
    %73 = tpu.matmul %69, %72, %cst_36 {dimension_numbers = #tpu.dot_dimension_numbers<[1], [0], [0], [1], [0, 0, 1, 1], [], []>} : vector<32x16xf32>, vector<16x256xf32>, vector<32x256xf32> -> vector<32x256xf32>
    %74 = tpu.concatenate %71, %73 in 0 : vector<32x256xf32>, vector<32x256xf32> -> vector<64x256xf32>
    %c0_37 = arith.constant 0 : index
    %c0_38 = arith.constant 0 : index
    %75 = vector.load %arg8[%c0_37, %c0_38] : memref<64x256xf32, #tpu.memory_space<vmem>>, vector<64x256xf32>
    tpu.vector_store %arg8[%c0_37, %c0_38], %74 {strides = array<i32>} : memref<64x256xf32, #tpu.memory_space<vmem>>, vector<64x256xf32>,
    return
  }
  func.func @transform_0(%arg0: i32) -> (i32, i32) {
    %c0_i32 = arith.constant 0 : i32
    %c0_i32_0 = arith.constant 0 : i32
    return %arg0, %c0_i32 : i32, i32
  }
  func.func @transform_1(%arg0: i32) -> (i32, i32) {
    %c0_i32 = arith.constant 0 : i32
    %c0_i32_0 = arith.constant 0 : i32
    %c0_i32_1 = arith.constant 0 : i32
    return %c0_i32, %c0_i32_0 : i32, i32
  }
  func.func @transform_2(%arg0: i32) -> (i32, i32) {
    %c0_i32 = arith.constant 0 : i32
    %c0_i32_0 = arith.constant 0 : i32
    %c0_i32_1 = arith.constant 0 : i32
    return %c0_i32, %c0_i32_0 : i32, i32
  }
  func.func @transform_3(%arg0: i32) -> (i32, i32) {
    %c0_i32 = arith.constant 0 : i32
    %c0_i32_0 = arith.constant 0 : i32
    %c0_i32_1 = arith.constant 0 : i32
    return %c0_i32, %c0_i32_0 : i32, i32
  }
  func.func @transform_4(%arg0: i32) -> (i32, i32) {
    %c0_i32 = arith.constant 0 : i32
    %c0_i32_0 = arith.constant 0 : i32
    %c0_i32_1 = arith.constant 0 : i32
    return %c0_i32, %c0_i32_0 : i32, i32
  }
  func.func @transform_5(%arg0: i32) -> (i32, i32) {
    %c0_i32 = arith.constant 0 : i32
    %c0_i32_0 = arith.constant 0 : i32
    %c0_i32_1 = arith.constant 0 : i32
    return %c0_i32, %c0_i32_0 : i32, i32
  }
  func.func @transform_6(%arg0: i32) -> (i32, i32) {
    %c0_i32 = arith.constant 0 : i32
    %c0_i32_0 = arith.constant 0 : i32
    %c0_i32_1 = arith.constant 0 : i32
    return %c0_i32, %c0_i32_0 : i32, i32
  }
  func.func @transform_7(%arg0: i32) -> (i32, i32) {
    %c0_i32 = arith.constant 0 : i32
    %c0_i32_0 = arith.constant 0 : i32
    return %arg0, %c0_i32 : i32, i32
  }
}

</mosaic_0001>

<bundles_post_ra>
// kernel: tpu_custom_call.1
= control target key start
LH: loop header
LB: loop body
LE: loop exit
PB: predicated region body
PF: predicated region fallthrough
CT: control target
= control target key end

     0   :  { %12 = vsyncpa [#allocation3], 0  ;;  %s1169_s0 = inlined_call_operand.vmem [shape: bf16[32,128], index: 0, kind: input, shape index: {}]   ;;  %s1170_s1 = inlined_call_operand.hbm [shape: bf16[128,128], index: 1, kind: input, shape index: {}]   ;;  %s1171_s2 = inlined_call_operand.vmem [shape: f32[1,128], index: 2, kind: input, shape index: {}]   ;;  %s1172_s3 = inlined_call_operand.hbm [shape: bf16[128,128], index: 3, kind: input, shape index: {}]   ;;  %s1173_s4 = inlined_call_operand.vmem [shape: f32[1,128], index: 4, kind: input, shape index: {}]   ;;  %s1174_s5 = inlined_call_operand.hbm [shape: f32[128,256], index: 5, kind: input, shape index: {}]   ;;  %s1175_s6 = inlined_call_operand.vmem [shape: f32[32,16], index: 6, kind: input, shape index: {}]   ;;  %s1176_s7 = inlined_call_operand.hbm [shape: f32[64,256], index: 7, kind: output, shape index: {}]  }
   0x1   :  { %13 = vsyncpa [#allocation6], 0 }
   0x2   :  { %14 = vsyncpa [#allocation4], 0  ;;  %s36_s26 = sshll.u32 %s1172_s3, 4  ;;  %s963_s27 = smov [#allocation5]   ;;  %s37_s26 = int_to_ptr.hbm [resolvable:$true] %s36_s26 }
   0x3   :  { %s38_s28 = sshll.u32 %s963_s27, 4  ;;  %s21_s8 = sshll.u32 %s1170_s1, 4  ;;  %s39_s28 = int_to_ptr.vmem [resolvable:$true] %s38_s28  ;;  %s22_s8 = int_to_ptr.hbm [resolvable:$true] %s21_s8 }
   0x4   :  { %s964_s9 = smov 64   ;;  %s965_s10 = smov 4  }
   0x5   :  { %44 = dma.hbm_to_vmem [thread:$0]  %s37_s26, 1024, %s39_s28, [#allocation6], %s964_s9, %s964_s9, %s965_s10  }
   0x6   :  { %s966_s11 = smov [#allocation2]   ;;  %s51_s15 = sshll.u32 %s1174_s5, 4  ;;  %s52_s15 = int_to_ptr.hbm [resolvable:$true] %s51_s15 }
   0x7   :  { %s23_s12 = sshll.u32 %s966_s11, 4  ;;  %s967_s3 = smov [#allocation7]   ;;  %s24_s12 = int_to_ptr.vmem [resolvable:$true] %s23_s12 }
   0x8   :  { %29 = dma.hbm_to_vmem [thread:$0]  %s22_s8, 1024, %s24_s12, [#allocation3], %s964_s9, %s964_s9, %s965_s10  }
   0x9   :  { %s53_s16 = sshll.u32 %s967_s3, 4  ;;  %s968_s17 = smov 256   ;;  %s54_s16 = int_to_ptr.vmem [resolvable:$true] %s53_s16 }
   0xa   :  { %s969_s18 = smov 16  }
   0xb   :  { %59 = dma.hbm_to_vmem [thread:$0]  %s52_s15, 4096, %s54_s16, [#allocation6], %s968_s17, %s968_s17, %s969_s18  }
   0xc   :  { %957 = dma.done.wait [#allocation3], 1024  }
   0xd   :  { %958 = vsyncadd [#allocation3], 4294966272 }
   0xe   :  { %959 = dma.done.wait [#allocation6], 5120  }
   0xf   :  { %960 = vsyncadd [#allocation6], 4294962176  ;;  %v826_v0 = vld [vmem:[#allocation2 + $0x38] sm:$0xff]  ;;  %v825_v1 = vld [vmem:[#allocation2 + $0x30] sm:$0xff]  ;;  %s711_s10 = sshll.u32 %s1176_s7, 4  ;;  %s712_s10 = int_to_ptr.hbm [resolvable:$true] %s711_s10 }
  0x10   :  { %158 = vmatpush.bf16.msra.mxu0 %v826_v0  ;;  %v824_v2 = vld [vmem:[#allocation2 + $0x28] sm:$0xff]  ;;  %v823_v3 = vld [vmem:[#allocation2 + $0x20] sm:$0xff]  ;;  %v822_v4 = vld [vmem:[#allocation2 + $0x18] sm:$0xff] }
  0x11   :  { %v821_v5 = vld [vmem:[#allocation2 + $0x10] sm:$0xff]  ;;  %v820_v6 = vld [vmem:[#allocation2 + $0x8] sm:$0xff]  ;;  %v819_v7 = vld [vmem:[#allocation2] sm:$0xff] }
  0x12   :  { %v817_v8 = vld [vmem:[%s1169_s0] sm:$0xff]  ;;  %v818_v9 = vld [vmem:[%s1169_s0 + $0x8] sm:$0xff]  ;;  %v834_v52 = vld [vmem:[#allocation5 + $0x38] sm:$0xff] }
  0x13   :  { %v843_v10 = vld [vmem:[%s1171_s2] ss:$0 sm:$0xff]  ;;  %447 = vmatpush.bf16.msra.mxu1 %v834_v52  ;;  %v833_v0 = vld [vmem:[#allocation5 + $0x30] sm:$0xff] }
  0x14   :  { %159 = vmatpush.bf16.msra.mxu0 %v825_v1 }
  0x17   :  { %448 = vmatpush.bf16.msra.mxu1 %v833_v0 }
  0x18   :  { %160 = vmatpush.bf16.msra.mxu0 %v824_v2 }
  0x1c   :  { %161 = vmatpush.bf16.msra.mxu0 %v823_v3 }
  0x20   :  { %162 = vmatpush.bf16.msra.mxu0 %v822_v4 }
  0x24   :  { %163 = vmatpush.bf16.msra.mxu0 %v821_v5 }
  0x28   :  { %164 = vmatpush.bf16.msra.mxu0 %v820_v6 }
  0x2c   :  { %165 = vmatpush.bf16.msra.mxu0 %v819_v7 }
  0x2f   :  { %166 = vmatmul.bf16.vlgmr.msra.gmra.mxu0 %v817_v8 }
  0x3f   :  { %171 = vmatmul.bf16.gmra.mxu0 %v818_v9  ;;  %v832_v9 = vld [vmem:[#allocation5 + $0x28] sm:$0xff] }
  0x40   :  { %449 = vmatpush.bf16.msra.mxu1 %v832_v9 }
  0xac   :  { %v167_v11 = vpop.f32.mrf.mxu0 }
  0xad   :  { %v1032_v12 = vadd.f32 %v843_v10, %v167_v11 }
  0xaf   :  { %v1035_v13 = vmul.f32 0.70710677, %v1032_v12 }
  0xb1   :  { %v1038_v14 = vand.u32 2147483647, %v1035_v13 }
  0xb3   :  { %v189_v15 = vmul.f32 0.5, %v1038_v14 }
  0xb4   :  { %v169_v16 = vpop.f32.mrf.mxu0 }
  0xb5   :  { %v193_v17 = vadd.f32 1.0, %v189_v15  ;;  %v1041_v18 = vadd.f32 %v843_v10, %v169_v16 }
  0xb7   :  { %845 = vrcp.f32 %v193_v17  ;;  %v1044_v19 = vmul.f32 0.70710677, %v1041_v18  ;;  %v208_v29 = vand.u32 2147483648, %v193_v17  ;;  %v206_v32 = vand.u32 2147483647, %v193_v17 }
  0xb8   :  { %vm202_vm1 = vweird.f32 %v193_v17 }
  0xb9   :  { %v1047_v20 = vand.u32 2147483647, %v1044_v19  ;;  %v209_v36 = vor.u32 1.1754944e-38, %v208_v29  ;;  %vm207_vm3 = vcmp.eq.f32.partialorder %v206_v32, 8.507059e+37 }
  0xbb   :  { %v190_v21 = vmul.f32 0.5, %v1047_v20 }
  0xbc   :  { %v172_v22 = vpop.f32.mrf.mxu0 }
  0xbd   :  { %v846_v23 = vpop.eup %845  ;;  %v1050_v24 = vadd.f32 %v843_v10, %v172_v22  ;;  %v194_v26 = vadd.f32 1.0, %v190_v21 }
  0xbe   :  { %v198_v25 = vmul.f32 %v846_v23, %v193_v17  ;;  %vm203_vm0 = vweird.f32 %v846_v23 }
  0xbf   :  { %v1053_v27 = vmul.f32 0.70710677, %v1050_v24  ;;  %847 = vrcp.f32 %v194_v26  ;;  %vm204_vm2 = vmor %vm202_vm1, %vm203_vm0  ;;  %v223_v47 = vand.u32 2147483648, %v194_v26  ;;  %v221_v49 = vand.u32 2147483647, %v194_v26 }
  0xc0   :  { %v199_v28 = vsub.f32 1.0, %v198_v25  ;;  %vm217_vm5 = vweird.f32 %v194_v26  ;;  %vm353_vm0 = vcmp.ge.f32.partialorder %v1035_v13, 0.0  ;;  %vm354_vm1 = vcmp.ge.f32.partialorder %v1044_v19, 0.0 }
  0xc1   :  { %v1056_v30 = vand.u32 2147483647, %v1053_v27  ;;  %v224_v57 = vor.u32 1.1754944e-38, %v223_v47  ;;  %vm222_vm7 = vcmp.eq.f32.partialorder %v221_v49, 8.507059e+37 }
  0xc2   :  { %v200_v31 = vmul.f32 %v846_v23, %v199_v28  ;;  %v831_v28 = vld [vmem:[#allocation5 + $0x20] sm:$0xff] }
  0xc3   :  { %v191_v33 = vmul.f32 0.5, %v1056_v30  ;;  %450 = vmatpush.bf16.msra.mxu1 %v831_v28 }
  0xc4   :  { %v201_v34 = vadd.f32 %v846_v23, %v200_v31  ;;  %v174_v35 = vpop.f32.mrf.mxu0 }
  0xc5   :  { %v195_v37 = vadd.f32 1.0, %v191_v33  ;;  %v1059_v38 = vadd.f32 %v843_v10, %v174_v35  ;;  %v848_v39 = vpop.eup %847 }
  0xc6   :  { %v205_v40 = vsel %vm204_vm2, %v846_v23, %v201_v34  ;;  %v213_v42 = vmul.f32 %v848_v39, %v194_v26  ;;  %vm218_vm4 = vweird.f32 %v848_v39  ;;  %vm355_vm2 = vcmp.ge.f32.partialorder %v1053_v27, 0.0  ;;  %v474_v27 = vld [vmem:[#allocation7 + $0x40] sm:$0xff] }
  0xc7   :  { %v1061_v41 = vsel %vm207_vm3, %v209_v36, %v205_v40  ;;  %849 = vrcp.f32 %v195_v37  ;;  %v1065_v45 = vmul.f32 0.70710677, %v1059_v38  ;;  %vm219_vm6 = vmor %vm217_vm5, %vm218_vm4  ;;  %v238_v2 = vand.u32 2147483648, %v195_v37 }
  0xc8   :  { %v257_v43 = vmul.f32 0.17087276, %v1061_v41  ;;  %v214_v44 = vsub.f32 1.0, %v213_v42  ;;  %v236_v5 = vand.u32 2147483647, %v195_v37  ;;  %vm232_vm9 = vweird.f32 %v195_v37  ;;  %v830_v42 = vld [vmem:[#allocation5 + $0x18] sm:$0xff] }
  0xc9   :  { %v1068_v50 = vand.u32 2147483647, %v1065_v45  ;;  %v239_v11 = vor.u32 1.1754944e-38, %v238_v2  ;;  %451 = vmatpush.bf16.msra.mxu1 %v830_v42  ;;  %vm356_vm3 = vcmp.ge.f32.partialorder %v1065_v45, 0.0  ;;  %v467_v45 = vld [vmem:[#allocation7 + $0x8] sm:$0xff]  ;;  %vm560_vm4 = vcmask 130048  }
  0xca   :  { %v261_v46 = vadd.f32 -0.82215226, %v257_v43  ;;  %v215_v48 = vmul.f32 %v848_v39, %v214_v44  ;;  %vm237_vm11 = vcmp.eq.f32.partialorder %v236_v5, 8.507059e+37 }
  0xcb   :  { %v192_v55 = vmul.f32 0.5, %v1068_v50 }
  0xcc   :  { %v265_v51 = vmul.f32 %v261_v46, %v1061_v41  ;;  %v216_v54 = vadd.f32 %v848_v39, %v215_v48 }
  0xcd   :  { %v850_v53 = vpop.eup %849  ;;  %v196_v60 = vadd.f32 1.0, %v192_v55 }
  0xce   :  { %v269_v56 = vadd.f32 1.4885159, %v265_v51  ;;  %v228_v58 = vmul.f32 %v850_v53, %v195_v37  ;;  %v220_v59 = vsel %vm219_vm6, %v848_v39, %v216_v54  ;;  %vm233_vm8 = vweird.f32 %v850_v53  ;;  %v829_v54 = vld [vmem:[#allocation5 + $0x10] sm:$0xff] }
  0xcf   :  { %v1073_v62 = vsel %vm222_vm7, %v224_v57, %v220_v59  ;;  %851 = vrcp.f32 %v196_v60  ;;  %vm234_vm10 = vmor %vm232_vm9, %vm233_vm8  ;;  %v251_v35 = vand.u32 2147483647, %v196_v60  ;;  %v253_v36 = vand.u32 2147483648, %v196_v60  ;;  %452 = vmatpush.bf16.msra.mxu1 %v829_v54 }
  0xd0   :  { %v273_v61 = vmul.f32 %v269_v56, %v1061_v41  ;;  %v229_v63 = vsub.f32 1.0, %v228_v58  ;;  %v258_v1 = vmul.f32 0.17087276, %v1073_v62  ;;  %vm247_vm13 = vweird.f32 %v196_v60 }
  0xd1   :  { %v254_v49 = vor.u32 1.1754944e-38, %v253_v36  ;;  %vm252_vm15 = vcmp.eq.f32.partialorder %v251_v35, 8.507059e+37  ;;  %v330_v36 = vsub.f32 0.0, %v1047_v20 }
  0xd2   :  { %v277_v3 = vadd.f32 -1.135204, %v273_v61  ;;  %v230_v4 = vmul.f32 %v850_v53, %v229_v63  ;;  %v262_v6 = vadd.f32 -0.82215226, %v258_v1  ;;  %v828_v1 = vld [vmem:[#allocation5 + $0x8] sm:$0xff] }
  0xd3   :  { %453 = vmatpush.bf16.msra.mxu1 %v828_v1 }
  0xd4   :  { %v281_v7 = vmul.f32 %v277_v3, %v1061_v41  ;;  %v231_v8 = vadd.f32 %v850_v53, %v230_v4  ;;  %v266_v10 = vmul.f32 %v262_v6, %v1073_v62  ;;  %v329_v4 = vsub.f32 0.0, %v1038_v14 }
  0xd5   :  { %v852_v17 = vpop.eup %851 }
  0xd6   :  { %v285_v15 = vadd.f32 0.27886808, %v281_v7  ;;  %v235_v16 = vsel %vm234_vm10, %v850_v53, %v231_v8  ;;  %v270_v21 = vadd.f32 1.4885159, %v266_v10  ;;  %v243_v26 = vmul.f32 %v852_v17, %v196_v60 }
  0xd7   :  { %v1078_v22 = vsel %vm237_vm11, %v239_v11, %v235_v16  ;;  %vm248_vm12 = vweird.f32 %v852_v17  ;;  %v827_v11 = vld [vmem:[#allocation5] sm:$0xff] }
  0xd8   :  { %v289_v23 = vmul.f32 %v285_v15, %v1061_v41  ;;  %v259_v25 = vmul.f32 0.17087276, %v1078_v22  ;;  %v274_v29 = vmul.f32 %v270_v21, %v1073_v62  ;;  %v244_v33 = vsub.f32 1.0, %v243_v26  ;;  %vm249_vm14 = vmor %vm247_vm13, %vm248_vm12  ;;  %454 = vmatpush.bf16.msra.mxu1 %v827_v11 }
  0xda   :  { %v293_v31 = vadd.f32 -0.18628806, %v289_v23  ;;  %v263_v32 = vadd.f32 -0.82215226, %v259_v25  ;;  %v278_v34 = vadd.f32 -1.135204, %v274_v29  ;;  %v245_v40 = vmul.f32 %v852_v17, %v244_v33 }
  0xdc   :  { %v297_v37 = vmul.f32 %v293_v31, %v1061_v41  ;;  %v267_v39 = vmul.f32 %v263_v32, %v1078_v22  ;;  %v282_v43 = vmul.f32 %v278_v34, %v1073_v62  ;;  %v246_v47 = vadd.f32 %v852_v17, %v245_v40 }
  0xde   :  { %v301_v44 = vadd.f32 0.09678418, %v297_v37  ;;  %v271_v46 = vadd.f32 1.4885159, %v267_v39  ;;  %v286_v48 = vadd.f32 0.27886808, %v282_v43  ;;  %v250_v53 = vsel %vm249_vm14, %v852_v17, %v246_v47 }
  0xdf   :  { %v1089_v56 = vsel %vm252_vm15, %v254_v49, %v250_v53  ;;  %v333_v17 = vmul.f32 %v329_v4, %v1038_v14 }
  0xe0   :  { %v305_v51 = vmul.f32 %v301_v44, %v1061_v41  ;;  %v275_v52 = vmul.f32 %v271_v46, %v1078_v22  ;;  %v290_v55 = vmul.f32 %v286_v48, %v1073_v62  ;;  %v260_v59 = vmul.f32 0.17087276, %v1089_v56 }
  0xe1   :  { %v334_v44 = vmul.f32 %v330_v36, %v1047_v20 }
  0xe2   :  { %v309_v57 = vadd.f32 0.37409195, %v305_v51  ;;  %v279_v58 = vadd.f32 -1.135204, %v275_v52  ;;  %v294_v60 = vadd.f32 -0.18628806, %v290_v55 }
  0xe3   :  { %v264_v0 = vadd.f32 -0.82215226, %v260_v59  ;;  %v331_v52 = vsub.f32 0.0, %v1056_v30 }
  0xe4   :  { %v313_v61 = vmul.f32 %v309_v57, %v1061_v41  ;;  %v283_v63 = vmul.f32 %v279_v58, %v1078_v22  ;;  %v298_v2 = vmul.f32 %v294_v60, %v1073_v62 }
  0xe5   :  { %v268_v6 = vmul.f32 %v264_v0, %v1089_v56  ;;  %v177_v0 = vmul.f32 0.5, %v1032_v12 }
  0xe6   :  { %v317_v3 = vadd.f32 1.0000237, %v313_v61  ;;  %v287_v5 = vadd.f32 0.27886808, %v283_v63  ;;  %v302_v7 = vadd.f32 0.09678418, %v298_v2  ;;  %v335_v61 = vmul.f32 %v331_v52, %v1056_v30 }
  0xe7   :  { %v272_v10 = vadd.f32 1.4885159, %v268_v6  ;;  %v494_v6 = vld [vmem:[#allocation7 + $0xe0] sm:$0xff]  ;;  %v493_v30 = vld [vmem:[#allocation7 + $0xd8] sm:$0xff] }
  0xe8   :  { %v321_v8 = vmul.f32 %v317_v3, %v1061_v41  ;;  %v291_v9 = vmul.f32 %v287_v5, %v1078_v22  ;;  %v306_v15 = vmul.f32 %v302_v7, %v1073_v62  ;;  %v497_v5 = vld [vmem:[#allocation7 + $0xf8] sm:$0xff]  ;;  %v495_v7 = vld [vmem:[#allocation7 + $0xe8] sm:$0xff] }
  0xe9   :  { %v276_v23 = vmul.f32 %v272_v10, %v1089_v56  ;;  %527 = vmatpush.msra.mxu3 %v497_v5  ;;  %v492_v10 = vld [vmem:[#allocation7 + $0xd0] sm:$0xff] }
  0xea   :  { %v325_v16 = vadd.f32 -1.2655122, %v321_v8  ;;  %v295_v21 = vadd.f32 -0.18628806, %v291_v9  ;;  %v310_v25 = vadd.f32 0.37409195, %v306_v15 }
  0xeb   :  { %v280_v29 = vadd.f32 -1.135204, %v276_v23  ;;  %528 = vmatpush.msra.mxu3 %v495_v7  ;;  %v332_v15 = vsub.f32 0.0, %v1068_v50  ;;  %v469_v7 = vld [vmem:[#allocation7 + $0x18] sm:$0xff] }
  0xec   :  { %v337_v26 = vadd.f32 %v333_v17, %v325_v16  ;;  %v299_v28 = vmul.f32 %v295_v21, %v1078_v22  ;;  %v314_v31 = vmul.f32 %v310_v25, %v1073_v62  ;;  %v490_v17 = vld [vmem:[#allocation7 + $0xc0] sm:$0xff]  ;;  %v491_v21 = vld [vmem:[#allocation7 + $0xc8] sm:$0xff] }
  0xed   :  { %v284_v34 = vmul.f32 %v280_v29, %v1089_v56  ;;  %529 = vmatpush.msra.mxu3 %v493_v30  ;;  %v489_v29 = vld [vmem:[#allocation7 + $0xb8] sm:$0xff] }
  0xee   :  { %v341_v32 = vmul.f32 1.442695, %v337_v26  ;;  %v303_v33 = vadd.f32 0.09678418, %v299_v28  ;;  %v318_v35 = vadd.f32 1.0000237, %v314_v31 }
  0xef   :  { %v288_v37 = vadd.f32 0.27886808, %v284_v34  ;;  %v488_v28 = vld [vmem:[#allocation7 + $0xb0] sm:$0xff]  ;;  %530 = vmatpush.msra.mxu3 %v491_v21  ;;  %v486_v34 = vld [vmem:[#allocation7 + $0xa0] sm:$0xff] }
  0xf0   :  { %853 = vpow2.f32 %v341_v32  ;;  %v307_v14 = vmul.f32 %v303_v33, %v1078_v22  ;;  %v322_v39 = vmul.f32 %v318_v35, %v1073_v62  ;;  %v336_v32 = vmul.f32 %v332_v15, %v1068_v50 }
  0xf1   :  { %v292_v42 = vmul.f32 %v288_v37, %v1089_v56  ;;  %v178_v35 = vmul.f32 0.5, %v1041_v18  ;;  %531 = vmatpush.msra.mxu3 %v489_v29  ;;  %v483_v18 = vld [vmem:[#allocation7 + $0x88] sm:$0xff] }
  0xf2   :  { %v311_v40 = vadd.f32 0.37409195, %v307_v14  ;;  %v326_v43 = vadd.f32 -1.2655122, %v322_v39  ;;  %v484_v39 = vld [vmem:[#allocation7 + $0x90] sm:$0xff] }
  0xf3   :  { %v296_v47 = vadd.f32 -0.18628806, %v292_v42 }
  0xf4   :  { %v315_v46 = vmul.f32 %v311_v40, %v1078_v22  ;;  %v338_v48 = vadd.f32 %v334_v44, %v326_v43  ;;  %v485_v40 = vld [vmem:[#allocation7 + $0x98] sm:$0xff]  ;;  %v482_v44 = vld [vmem:[#allocation7 + $0x80] sm:$0xff] }
  0xf5   :  { %v300_v53 = vmul.f32 %v296_v47, %v1089_v56 }
  0xf6   :  { %v854_v49 = vpop.eup %853  ;;  %v319_v51 = vadd.f32 1.0000237, %v315_v46  ;;  %v343_v54 = vmul.f32 1.442695, %v338_v48  ;;  %v480_v48 = vld [vmem:[#allocation7 + $0x70] sm:$0xff] }
  0xf7   :  { %v349_v55 = vmul.f32 %v854_v49, %v1061_v41  ;;  %v304_v58 = vadd.f32 0.09678418, %v300_v53  ;;  %v496_v41 = vld [vmem:[#allocation7 + $0xf0] sm:$0xff]  ;;  %v478_v53 = vld [vmem:[#allocation7 + $0x60] sm:$0xff] }
  0xf8   :  { %v323_v57 = vmul.f32 %v319_v51, %v1078_v22  ;;  %855 = vpow2.f32 %v343_v54  ;;  %498 = vmatpush.msra.mxu2 %v496_v41  ;;  %v481_v51 = vld [vmem:[#allocation7 + $0x78] sm:$0xff]  ;;  %v479_v54 = vld [vmem:[#allocation7 + $0x68] sm:$0xff] }
  0xf9   :  { %v357_v59 = vsub.f32 1.0, %v349_v55  ;;  %v765_v60 = vadd.f32 -1.0, %v349_v55  ;;  %v308_v63 = vmul.f32 %v304_v58, %v1089_v56  ;;  %v477_v58 = vld [vmem:[#allocation7 + $0x58] sm:$0xff] }
  0xfa   :  { %v327_v20 = vadd.f32 -1.2655122, %v323_v57  ;;  %499 = vmatpush.msra.mxu2 %v494_v6  ;;  %v476_v57 = vld [vmem:[#allocation7 + $0x50] sm:$0xff] }
  0xfb   :  { %v365_v1 = vsel %vm353_vm0, %v357_v59, %v765_v60  ;;  %v312_v3 = vadd.f32 0.37409195, %v308_v63  ;;  %v468_v6 = vld [vmem:[#allocation7 + $0x10] sm:$0xff] }
  0xfc   :  { %v339_v2 = vadd.f32 %v335_v61, %v327_v20  ;;  %v369_v4 = vadd.f32 1.0, %v365_v1  ;;  %500 = vmatpush.msra.mxu2 %v492_v10  ;;  %v475_v20 = vld [vmem:[#allocation7 + $0x48] sm:$0xff]  ;;  %v472_v61 = vld [vmem:[#allocation7 + $0x30] sm:$0xff]  ;;  %v470_v1 = vld [vmem:[#allocation7 + $0x20] sm:$0xff] }
  0xfd   :  { %v316_v13 = vmul.f32 %v312_v3, %v1089_v56  ;;  %v471_v3 = vld [vmem:[#allocation7 + $0x28] sm:$0xff] }
  0xfe   :  { %v345_v8 = vmul.f32 1.442695, %v339_v2  ;;  %v373_v9 = vmul.f32 %v369_v4, %v177_v0  ;;  %v856_v11 = vpop.eup %855  ;;  %501 = vmatpush.msra.mxu2 %v490_v17  ;;  %v473_v0 = vld [vmem:[#allocation7 + $0x38] sm:$0xff]  ;;  %v180_v4 = vmul.f32 0.5, %v1059_v38 }
  0xff   :  { %v320_v12 = vadd.f32 1.0000237, %v316_v13  ;;  %v350_v16 = vmul.f32 %v856_v11, %v1073_v62  ;;  %v487_v62 = vld [vmem:[#allocation7 + $0xa8] sm:$0xff]  ;;  %v844_v13 = vld [vmem:[%s1173_s4] ss:$0 sm:$0xff] }
 0x100   :  { %857 = vpow2.f32 %v345_v8  ;;  %502 = vmatpush.msra.mxu2 %v488_v28  ;;  %532 = vmatpush.msra.mxu3 %v487_v62  ;;  %v466_v8 = vld [vmem:[#allocation7] sm:$0xff]  ;;  %v559_v62 = vld [vmem:[%s1175_s6 + $0x18] sm:$0xff] }
 0x101   :  { %v324_v23 = vmul.f32 %v320_v12, %v1089_v56  ;;  %v358_v25 = vsub.f32 1.0, %v350_v16  ;;  %v766_v26 = vadd.f32 -1.0, %v350_v16 }
 0x102   :  { %503 = vmatpush.msra.mxu2 %v486_v34  ;;  %533 = vmatpush.msra.mxu3 %v485_v40  ;;  %v558_v34 = vld [vmem:[%s1175_s6 + $0x10] sm:$0xff] }
 0x103   :  { %v328_v31 = vadd.f32 -1.2655122, %v324_v23  ;;  %v366_v33 = vsel %vm354_vm1, %v358_v25, %v766_v26  ;;  %v556_v26 = vld [vmem:[%s1175_s6] sm:$0xff] }
 0x104   :  { %v370_v36 = vadd.f32 1.0, %v366_v33  ;;  %504 = vmatpush.msra.mxu2 %v484_v39  ;;  %534 = vmatpush.msra.mxu3 %v483_v18 }
 0x105   :  { %v340_v37 = vadd.f32 %v336_v32, %v328_v31  ;;  %v557_v31 = vld [vmem:[%s1175_s6 + $0x8] sm:$0xff]  ;;  %s970_s6 = smov [#allocation8]  }
 0x106   :  { %v858_v14 = vpop.eup %857  ;;  %v374_v42 = vmul.f32 %v370_v36, %v178_v35  ;;  %505 = vmatpush.msra.mxu2 %v482_v44  ;;  %535 = vmatpush.msra.mxu3 %v481_v51  ;;  %s709_s30 = sshll.u32 %s970_s6, 4  ;;  %s710_s30 = int_to_ptr.vmem [resolvable:$true] %s709_s30 }
 0x107   :  { %v351_v19 = vmul.f32 %v858_v14, %v1078_v22  ;;  %v347_v43 = vmul.f32 1.442695, %v340_v37  ;;  %v179_v22 = vmul.f32 0.5, %v1050_v24 }
 0x108   :  { %v377_v50 = vpack.c.bf16 %v374_v42, %v373_v9  ;;  %506 = vmatpush.msra.mxu2 %v480_v48  ;;  %536 = vmatpush.msra.mxu3 %v479_v54 }
 0x109   :  { %v359_v46 = vsub.f32 1.0, %v351_v19  ;;  %v767_v47 = vadd.f32 -1.0, %v351_v19  ;;  %859 = vpow2.f32 %v347_v43 }
 0x10a   :  { %455 = vmatmul.bf16.vlgmr.msra.gmra.mxu1 %v377_v50  ;;  %507 = vmatpush.msra.mxu2 %v478_v53 }
 0x10b   :  { %v367_v49 = vsel %vm355_vm2, %v359_v46, %v767_v47  ;;  %537 = vmatpush.msra.mxu3 %v477_v58 }
 0x10c   :  { %v371_v52 = vadd.f32 1.0, %v367_v49  ;;  %508 = vmatpush.msra.mxu2 %v476_v57 }
 0x10d   :  { %538 = vmatpush.msra.mxu3 %v475_v20 }
 0x10e   :  { %v375_v55 = vmul.f32 %v371_v52, %v179_v22  ;;  %509 = vmatpush.msra.mxu2 %v474_v27 }
 0x10f   :  { %v860_v59 = vpop.eup %859  ;;  %539 = vmatpush.msra.mxu3 %v473_v0 }
 0x110   :  { %v352_v60 = vmul.f32 %v860_v59, %v1089_v56  ;;  %510 = vmatpush.msra.mxu2 %v472_v61 }
 0x111   :  { %540 = vmatpush.msra.mxu3 %v471_v3 }
 0x112   :  { %v360_v24 = vsub.f32 1.0, %v352_v60  ;;  %v768_v63 = vadd.f32 -1.0, %v352_v60  ;;  %511 = vmatpush.msra.mxu2 %v470_v1 }
 0x113   :  { %541 = vmatpush.msra.mxu3 %v469_v7 }
 0x114   :  { %v368_v2 = vsel %vm356_vm3, %v360_v24, %v768_v63  ;;  %512 = vmatpush.msra.mxu2 %v468_v6 }
 0x115   :  { %v372_v41 = vadd.f32 1.0, %v368_v2  ;;  %542 = vmatpush.msra.mxu3 %v467_v45 }
 0x116   :  { %513 = vmatpush.msra.mxu2 %v466_v8 }
 0x117   :  { %v376_v56 = vmul.f32 %v372_v41, %v180_v4 }
 0x119   :  { %v378_v5 = vpack.c.bf16 %v376_v56, %v375_v55 }
 0x11b   :  { %460 = vmatmul.bf16.gmra.mxu1 %v378_v5 }
 0x187   :  { %v456_v38 = vpop.f32.mrf.mxu1 }
 0x188   :  { %v457_v9 = vadd.f32 %v844_v13, %v456_v38 }
 0x18a   :  { %514 = vmatmul.f32.vlgmr.msra.gmra.mxu2 %v457_v9  ;;  %543 = vmatmul.f32.vlgmr.msra.gmra.mxu3 %v457_v9 }
 0x18f   :  { %v458_v10 = vpop.f32.mrf.mxu1 }
 0x190   :  { %v459_v30 = vadd.f32 %v844_v13, %v458_v10 }
 0x192   :  { %517 = vmatmul.f32.gmra.mxu2 %v459_v30  ;;  %546 = vmatmul.f32.gmra.mxu3 %v459_v30 }
 0x198   :  { %v461_v11 = vpop.f32.mrf.mxu1 }
 0x199   :  { %v462_v12 = vadd.f32 %v844_v13, %v461_v11 }
 0x19b   :  { %520 = vmatmul.f32.gmra.mxu2 %v462_v12  ;;  %549 = vmatmul.f32.gmra.mxu3 %v462_v12 }
 0x1a0   :  { %v463_v15 = vpop.f32.mrf.mxu1 }
 0x1a1   :  { %v464_v16 = vadd.f32 %v844_v13, %v463_v15 }
 0x1a3   :  { %523 = vmatmul.f32.gmra.mxu2 %v464_v16  ;;  %552 = vmatmul.f32.gmra.mxu3 %v464_v16 }
 0x20d   :  { %v515_v17 = vpop.f32.mrf.mxu2  ;;  %v544_v21 = vpop.f32.mrf.mxu3 }
 0x215   :  { %v518_v23 = vpop.f32.mrf.mxu2  ;;  %v547_v25 = vpop.f32.mrf.mxu3 }
 0x216   :  { %587 = vmatpush.msrb.mxu0 %v518_v23  ;;  %616 = vmatpush.msrb.mxu1 %v547_v25 }
 0x218   :  { %588 = vmatpush.msrb.mxu0 %v515_v17  ;;  %617 = vmatpush.msrb.mxu1 %v544_v21 }
 0x219   :  { %801 = vmatmul.msk.f32.vlgmr.msrb.gmra.mxu0 %vm560_vm4, %v556_v26  ;;  %805 = vmatmul.msk.f32.vlgmr.msrb.gmra.mxu1 %vm560_vm4, %v556_v26 }
 0x21e   :  { %v521_v28 = vpop.f32.mrf.mxu2  ;;  %v550_v29 = vpop.f32.mrf.mxu3 }
 0x221   :  { %802 = vmatmul.msk.f32.gmra.mxu0 %vm560_vm4, %v557_v31  ;;  %806 = vmatmul.msk.f32.gmra.mxu1 %vm560_vm4, %v557_v31 }
 0x226   :  { %v524_v32 = vpop.f32.mrf.mxu2  ;;  %v553_v33 = vpop.f32.mrf.mxu3 }
 0x227   :  { %645 = vmatpush.msrb.mxu2 %v524_v32  ;;  %674 = vmatpush.msrb.mxu3 %v553_v33 }
 0x229   :  { %646 = vmatpush.msrb.mxu2 %v521_v28  ;;  %675 = vmatpush.msrb.mxu3 %v550_v29 }
 0x22a   :  { %809 = vmatmul.msk.f32.vlgmr.msrb.gmra.mxu2 %vm560_vm4, %v556_v26  ;;  %813 = vmatmul.msk.f32.vlgmr.msrb.gmra.mxu3 %vm560_vm4, %v556_v26 }
 0x22b   :  { %803 = vmatmul.msk.f32.gmra.mxu0 %vm560_vm4, %v558_v34  ;;  %807 = vmatmul.msk.f32.gmra.mxu1 %vm560_vm4, %v558_v34 }
 0x232   :  { %810 = vmatmul.msk.f32.gmra.mxu2 %vm560_vm4, %v557_v31  ;;  %814 = vmatmul.msk.f32.gmra.mxu3 %vm560_vm4, %v557_v31 }
 0x233   :  { %804 = vmatmul.msk.f32.gmra.mxu0 %vm560_vm4, %v559_v62  ;;  %808 = vmatmul.msk.f32.gmra.mxu1 %vm560_vm4, %v559_v62 }
 0x23a   :  { %811 = vmatmul.msk.f32.gmra.mxu2 %vm560_vm4, %v558_v34  ;;  %815 = vmatmul.msk.f32.gmra.mxu3 %vm560_vm4, %v558_v34 }
 0x242   :  { %812 = vmatmul.msk.f32.gmra.mxu2 %vm560_vm4, %v559_v62  ;;  %816 = vmatmul.msk.f32.gmra.mxu3 %vm560_vm4, %v559_v62 }
 0x296   :  { %v590_v35 = vpop.f32.mrf.mxu0  ;;  %v619_v36 = vpop.f32.mrf.mxu1 }
 0x297   :  { %689 = vst [vmem:[#allocation8] sm:$0xff] %v590_v35 }
 0x298   :  { %690 = vst [vmem:[#allocation8 + $0x8] sm:$0xff] %v619_v36 }
 0x29e   :  { %v593_v14 = vpop.f32.mrf.mxu0  ;;  %v622_v37 = vpop.f32.mrf.mxu1 }
 0x29f   :  { %691 = vst [vmem:[#allocation8 + $0x10] sm:$0xff] %v593_v14 }
 0x2a0   :  { %692 = vst [vmem:[#allocation8 + $0x18] sm:$0xff] %v622_v37 }
 0x2a8   :  { %v596_v39 = vpop.f32.mrf.mxu0  ;;  %v625_v40 = vpop.f32.mrf.mxu1 }
 0x2a9   :  { %693 = vst [vmem:[#allocation8 + $0x20] sm:$0xff] %v596_v39 }
 0x2aa   :  { %694 = vst [vmem:[#allocation8 + $0x28] sm:$0xff] %v625_v40 }
 0x2ad   :  { %v648_v42 = vpop.f32.mrf.mxu2  ;;  %v677_v19 = vpop.f32.mrf.mxu3 }
 0x2ae   :  { %697 = vst [vmem:[#allocation8 + $0x40] sm:$0xff] %v648_v42 }
 0x2af   :  { %698 = vst [vmem:[#allocation8 + $0x48] sm:$0xff] %v677_v19 }
 0x2b0   :  { %v599_v43 = vpop.f32.mrf.mxu0  ;;  %v628_v44 = vpop.f32.mrf.mxu1 }
 0x2b1   :  { %695 = vst [vmem:[#allocation8 + $0x30] sm:$0xff] %v599_v43 }
 0x2b2   :  { %696 = vst [vmem:[#allocation8 + $0x38] sm:$0xff] %v628_v44 }
 0x2b5   :  { %v651_v50 = vpop.f32.mrf.mxu2  ;;  %v680_v46 = vpop.f32.mrf.mxu3 }
 0x2b6   :  { %699 = vst [vmem:[#allocation8 + $0x50] sm:$0xff] %v651_v50 }
 0x2b7   :  { %700 = vst [vmem:[#allocation8 + $0x58] sm:$0xff] %v680_v46 }
 0x2bd   :  { %v654_v47 = vpop.f32.mrf.mxu2  ;;  %v683_v18 = vpop.f32.mrf.mxu3 }
 0x2be   :  { %701 = vst [vmem:[#allocation8 + $0x60] sm:$0xff] %v654_v47 }
 0x2bf   :  { %702 = vst [vmem:[#allocation8 + $0x68] sm:$0xff] %v683_v18 }
 0x2c5   :  { %v657_v48 = vpop.f32.mrf.mxu2  ;;  %v686_v49 = vpop.f32.mrf.mxu3 }
 0x2c6   :  { %703 = vst [vmem:[#allocation8 + $0x70] sm:$0xff] %v657_v48 }
 0x2c7   :  { %704 = vst [vmem:[#allocation8 + $0x78] sm:$0xff] %v686_v49 }
 0x2c8   :  { %717 = dma.vmem_to_hbm [thread:$0]  %s710_s30, 2048, %s712_s10, [#allocation4], %s968_s17, %s968_s17, %s969_s18  }
 0x2c9   :  { %961 = dma.done.wait [#allocation4], 2048  }
 0x2ca   :  { %962 = vsyncadd [#allocation4], 4294965248 }
 0x2cb   :  { %722 = vsyncpa [#allocation3], 1 }
 0x2cc   :  { %723 = vsyncpa [#allocation6], 1 }
 0x2cd   :  { %724 = vsyncpa [#allocation4], 1 }

</bundles_post_ra>
